<compile_context>
chip_gen: v5e
topology: v5e:2x2
jax: 0.10.0
libtpu: 0.0.40
codegen_flags: <defaults>
</compile_context>

<pallas_src>
import math

import jax
import jax.numpy as jnp
from jax.experimental import pallas as pl
from jax.experimental.pallas import tpu as pltpu


def _round_up(n, m):
    return ((n + m - 1) // m) * m


def _mu_kernel(x_ref, w_ref, b_ref, mu_ref):
    # One MXU matmul per batch tile (f32 accumulation); bias add on the VPU.
    mu = jnp.dot(x_ref[...], w_ref[...], preferred_element_type=jnp.float32)
    mu_ref[...] = (mu + b_ref[...].astype(jnp.float32)).astype(mu_ref.dtype)


def _choose_batch_tile(B, block_b):
    """Batch tile: a multiple of 8 (sublanes) or the full batch.

    Both choices satisfy the (8,128) BlockSpec rule; ragged last tiles are
    handled by a pl.cdiv grid (no batch padding in the wrapper).
    """
    if B < 256 and B % 8 != 0:
        # Small, non-sublane-aligned batch: a single full-dim tile (no padding).
        return B
    tb = min(block_b, _round_up(B, 8))
    if B >= 256:
        # Keep >= 2 grid steps so "parallel" has work for both v7x TensorCores
        # and the pipeline has something to overlap on all generations.
        tb = min(tb, _round_up((B + 1) // 2, 8))
    return tb


def _vmem_tile_bytes(rows, cols, itemsize):
    # VMEM lays buffers out in (8, 128) granules; budget accordingly.
    return _round_up(rows, 8) * _round_up(cols, 128) * itemsize


def gaussian_fixed_variance_forward(x, w, b, *, std=0.01, block_b=512):
    """x: (..., IN); w: (IN, OUT) (stored transposed vs torch); b: (1, OUT).

    Returns (mu, scale): mu = x @ w + b with shape (..., OUT); scale is the
    fixed scalar std (the Independent(Normal) wrapper broadcasts it lazily --
    no (B, OUT) constant array is materialized).
    """
    *lead, IN = x.shape
    OUT = w.shape[1]
    out_dtype = x.dtype

    x2 = x.reshape(-1, IN)  # nn.Linear acts on the last dim
    B = x2.shape[0]

    TB = _choose_batch_tile(B, block_b)
    grid = (pl.cdiv(B, TB),)

    # Resident weights: constant index_map -> fetched once, stay in VMEM across
    # batch tiles.  For large weight matrices drop the redundant second pipeline
    # buffer to save VMEM headroom (keeps TB large on v7x 64 MiB / v5e 16 MiB
    # scoped defaults); for tiny heads the default double buffer costs nothing.
    w_item = jnp.dtype(w.dtype).itemsize
    w_bytes = IN * OUT * w_item
    if w_bytes >= (256 << 10):
        w_spec = pl.BlockSpec((IN, OUT), lambda i: (0, 0),
                              pipeline_mode=pl.Buffered(1))
        b_spec = pl.BlockSpec((1, OUT), lambda i: (0, 0),
                              pipeline_mode=pl.Buffered(1))
        w_bufs = 1
    else:
        w_spec = pl.BlockSpec((IN, OUT), lambda i: (0, 0))
        b_spec = pl.BlockSpec((1, OUT), lambda i: (0, 0))
        w_bufs = 2

    x_item = jnp.dtype(x.dtype).itemsize
    b_item = jnp.dtype(b.dtype).itemsize
    out_item = jnp.dtype(out_dtype).itemsize
    vmem_need = (
        2 * _vmem_tile_bytes(TB, IN, x_item)            # double-buffered x tiles
        + w_bufs * _vmem_tile_bytes(IN, OUT, w_item)    # resident W
        + w_bufs * _vmem_tile_bytes(1, OUT, b_item)     # resident b
        + 2 * _vmem_tile_bytes(TB, OUT, out_item)       # double-buffered mu tiles
    )
    vmem_limit = int(min(64 << 20, max(2 * vmem_need + (2 << 20), 16 << 20)))

    cost = pl.CostEstimate(
        flops=2 * B * IN * OUT,
        transcendentals=0,
        bytes_accessed=(x2.size * x_item + w.size * w_item
                        + b.size * b_item + B * OUT * out_item),
    )

    mu2 = pl.pallas_call(
        _mu_kernel,
        out_shape=jax.ShapeDtypeStruct((B, OUT), out_dtype),
        grid_spec=pltpu.PrefetchScalarGridSpec(
            num_scalar_prefetch=0,
            grid=grid,
            in_specs=[
                pl.BlockSpec((TB, IN), lambda i: (i, 0)),   # x: per batch tile
                w_spec,                                      # W: VMEM-resident
                b_spec,                                      # b: VMEM-resident
            ],
            out_specs=pl.BlockSpec((TB, OUT), lambda i: (i, 0)),
        ),
        compiler_params=pltpu.CompilerParams(
            dimension_semantics=("parallel",),   # batch tiles are independent
            vmem_limit_bytes=vmem_limit,
        ),
        cost_estimate=cost,
    )(x2, w, b)

    mu = mu2.reshape(*lead, OUT)
    # Fixed, non-learnable standard deviation: return the scalar (kept in f32 so
    # bf16 outputs don't perturb the constant); the wrapper broadcasts lazily.
    scale = jnp.asarray(std, jnp.float32)
    # TODO(synk): torch.distributions.Independent/Normal object construction has
    # no Pallas equivalent; (mu, scale) fully parameterize the distribution.
    return mu, scale


def init_params(key, in_features, out_features):
    """Deterministic init matching GaussianFixedVarianceLayer.initialize().

    nn.init.xavier_normal_(self.mu.weight, gain=1.0):
        std = gain * sqrt(2 / (fan_in + fan_out))
    Bias keeps nn.Linear's default U(-1/sqrt(fan_in), 1/sqrt(fan_in)).
    Weight stored transposed as (IN, OUT) for the x @ W layout.
    """
    k_w, k_b = jax.random.split(key)
    w_std = math.sqrt(2.0 / (in_features + out_features))
    bound = 1.0 / math.sqrt(in_features)
    w = w_std * jax.random.normal(k_w, (in_features, out_features), jnp.float32)
    b = jax.random.uniform(k_b, (1, out_features), jnp.float32, -bound, bound)
    return w, b


if __name__ == "__main__":
    key = jax.random.PRNGKey(0)
    k_x, k_p, k_x2 = jax.random.split(key, 3)

    batch = 8
    in_features = 32
    out_features = 16
    std = 0.01

    x = jax.random.normal(k_x, (batch, in_features), jnp.float32)
    w, b = init_params(k_p, in_features, out_features)

    # Single-tile path (small batch).
    mu, scale = gaussian_fixed_variance_forward(x, w, b, std=std)
    jax.block_until_ready((mu, scale))

    mu_ref = x @ w + b
    assert mu.shape == (batch, out_features)
    assert jnp.allclose(mu, mu_ref, atol=1e-5, rtol=1e-5)
    assert scale.shape == () and jnp.allclose(scale, jnp.float32(std))

    # Multi-tile path: >=2 grid steps + ragged (non-multiple-of-tile) last tile.
    batch2 = 300
    x2 = jax.random.normal(k_x2, (batch2, in_features), jnp.float32)
    mu2, _ = gaussian_fixed_variance_forward(x2, w, b, std=std, block_b=128)
    jax.block_until_ready(mu2)
    assert mu2.shape == (batch2, out_features)
    assert jnp.allclose(mu2, x2 @ w + b, atol=1e-5, rtol=1e-5)

    print("KERNEL_OK")
</pallas_src>

<mosaic_0001>
module attributes {stable_mosaic.version = 11 : i64} {
  func.func @_mu_kernel(%arg0: i32, %arg1: memref<8x32xf32, #tpu.memory_space<vmem>>, %arg2: memref<32x16xf32, #tpu.memory_space<vmem>>, %arg3: memref<1x16xf32, #tpu.memory_space<vmem>>, %arg4: memref<8x16xf32, #tpu.memory_space<vmem>>) attributes {dimension_semantics = [#tpu.dimension_semantics<parallel>], iteration_bounds = array<i64: 1>, scalar_prefetch = 0 : i64, scratch_operands = 0 : i64, tpu.core_type = #tpu.core_type<tc>, window_params = [{transform_indices = @transform_0, window_bounds = array<i64: 8, 32>}, {pipeline_mode = #tpu.pipeline_mode<synchronous>, transform_indices = @transform_1, window_bounds = array<i64: 32, 16>}, {pipeline_mode = #tpu.pipeline_mode<synchronous>, transform_indices = @transform_2, window_bounds = array<i64: 1, 16>}, {transform_indices = @transform_3, window_bounds = array<i64: 8, 16>}]} {
    %c0 = arith.constant 0 : index
    %c0_0 = arith.constant 0 : index
    %0 = vector.load %arg1[%c0, %c0_0] : memref<8x32xf32, #tpu.memory_space<vmem>>, vector<8x32xf32>
    %c0_1 = arith.constant 0 : index
    %c0_2 = arith.constant 0 : index
    %1 = vector.load %arg2[%c0_1, %c0_2] : memref<32x16xf32, #tpu.memory_space<vmem>>, vector<32x16xf32>
    %cst = arith.constant dense<0.000000e+00> : vector<8x16xf32>
    %2 = tpu.matmul %0, %1, %cst {dimension_numbers = #tpu.dot_dimension_numbers<[1], [0], [0], [1], [0, 0, 1, 1], [], []>} : vector<8x32xf32>, vector<32x16xf32>, vector<8x16xf32> -> vector<8x16xf32>
    %c0_3 = arith.constant 0 : index
    %c0_4 = arith.constant 0 : index
    %3 = vector.load %arg3[%c0_3, %c0_4] : memref<1x16xf32, #tpu.memory_space<vmem>>, vector<1x16xf32>
    %4 = vector.broadcast %3 : vector<1x16xf32> to vector<8x16xf32>
    %5 = arith.addf %2, %4 : vector<8x16xf32>
    %c0_5 = arith.constant 0 : index
    %c0_6 = arith.constant 0 : index
    %6 = vector.load %arg4[%c0_5, %c0_6] : memref<8x16xf32, #tpu.memory_space<vmem>>, vector<8x16xf32>
    tpu.vector_store %arg4[%c0_5, %c0_6], %5 {strides = array<i32>} : memref<8x16xf32, #tpu.memory_space<vmem>>, vector<8x16xf32>,
    return
  }
  func.func @transform_0(%arg0: i32) -> (i32, i32) {
    %c0_i32 = arith.constant 0 : i32
    %c0_i32_0 = arith.constant 0 : i32
    return %arg0, %c0_i32 : i32, i32
  }
  func.func @transform_1(%arg0: i32) -> (i32, i32) {
    %c0_i32 = arith.constant 0 : i32
    %c0_i32_0 = arith.constant 0 : i32
    %c0_i32_1 = arith.constant 0 : i32
    return %c0_i32, %c0_i32_0 : i32, i32
  }
  func.func @transform_2(%arg0: i32) -> (i32, i32) {
    %c0_i32 = arith.constant 0 : i32
    %c0_i32_0 = arith.constant 0 : i32
    %c0_i32_1 = arith.constant 0 : i32
    return %c0_i32, %c0_i32_0 : i32, i32
  }
  func.func @transform_3(%arg0: i32) -> (i32, i32) {
    %c0_i32 = arith.constant 0 : i32
    %c0_i32_0 = arith.constant 0 : i32
    return %arg0, %c0_i32 : i32, i32
  }
}

</mosaic_0001>

<bundles_post_ra>
// kernel: tpu_custom_call.1
= control target key start
LH: loop header
LB: loop body
LE: loop exit
PB: predicated region body
PF: predicated region fallthrough
CT: control target
= control target key end

     0   :  { %s137_s0 = inlined_call_operand.vmem [shape: f32[8,32], index: 0, kind: input, shape index: {}]   ;;  %s138_s1 = inlined_call_operand.vmem [shape: f32[32,16], index: 1, kind: input, shape index: {}]   ;;  %s139_s2 = inlined_call_operand.vmem [shape: f32[1,16], index: 2, kind: input, shape index: {}]   ;;  %s140_s3 = inlined_call_operand.hbm [shape: f32[8,16], index: 3, kind: output, shape index: {}]  }
   0x1   :  { %v19_v0 = vld [vmem:[%s138_s1 + $0x18] sm:$0xff]  ;;  %v18_v1 = vld [vmem:[%s138_s1 + $0x10] sm:$0xff]  ;;  %v17_v2 = vld [vmem:[%s138_s1 + $0x8] sm:$0xff] }
   0x2   :  { %40 = vmatpush.msra.mxu0 %v19_v0 }
   0x3   :  { %8 = vsyncpa [#allocation3], 0  ;;  %v16_v3 = vld [vmem:[%s138_s1] sm:$0xff]  ;;  %vm24_vm0 = vcmask 261120   ;;  %s95_s24 = smov [#allocation2]   ;;  %s57_s28 = sshll.u32 %s140_s3, 4  ;;  %s58_s28 = int_to_ptr.hbm [resolvable:$true] %s57_s28 }
   0x4   :  { %41 = vmatpush.msra.mxu0 %v18_v1  ;;  %v15_v4 = vld [vmem:[%s137_s0] sm:$0xff]  ;;  %s55_s25 = sshll.u32 %s95_s24, 4  ;;  %vm48_vm1 = vcmask 130048   ;;  %s56_s25 = int_to_ptr.vmem [resolvable:$true] %s55_s25 }
   0x5   :  { %v68_v5 = vld [vmem:[%s139_s2] ss:$0 sm:$0xff] }
   0x6   :  { %42 = vmatpush.msra.mxu0 %v17_v2 }
   0x8   :  { %43 = vmatpush.msra.mxu0 %v16_v3 }
   0x9   :  { %66 = vmatmul.msk.f32.vlgmr.msra.gmra.mxu0 %vm24_vm0, %v15_v4 }
  0x86   :  { %v45_v6 = vpop.f32.mrf.mxu0 }
  0x87   :  { %v46_v7 = vadd.f32 %v68_v5, %v45_v6 }
  0x89   :  { %49 = vst.msk [vmem:[#allocation2] sm:$0xff] %vm48_vm1, %v46_v7 }
  0x8a   :  { %60 = dma.vmem_to_hbm [thread:$0]  %s56_s25, 128, %s58_s28, [#allocation3]  }
  0x8b   :  { %93 = dma.done.wait [#allocation3], 128  }
  0x8c   :  { %94 = vsyncadd [#allocation3], 4294967168 }
  0x8d   :  { %65 = vsyncpa [#allocation3], 1 }

</bundles_post_ra>
